<compile_context>
chip_gen: v5e
topology: v5e:2x2
jax: 0.10.0
libtpu: 0.0.40
codegen_flags: <defaults>
</compile_context>

<pallas_src>
import functools

import jax
import jax.numpy as jnp
from jax.experimental import pallas as pl
from jax.experimental.pallas import tpu as pltpu

LANES = 128
SUBLANES = 8
MAX_ROW_TILE = 2048  # 2048*128*4B = 1 MiB per input block (f32)


def _round_up(x, m):
    return ((x + m - 1) // m) * m


def _focal_bce_kernel(x_ref, t_ref, partial_ref, *, gamma, total_elems,
                      needs_mask, row_tile):
    x = x_ref[...].astype(jnp.float32)
    t = t_ref[...].astype(jnp.float32)

    # Single exp(-|x|) shared by sigmoid and the stable BCE log term.
    z = jnp.exp(-jnp.abs(x))
    inv = 1.0 / (1.0 + z)                       # sigmoid(|x|)
    prob = jnp.where(x >= 0.0, inv, z * inv)    # == sigmoid(x)

    # Numerically stable binary_cross_entropy_with_logits (reduction='none').
    bce = jnp.maximum(x, 0.0) - x * t + jnp.log1p(z)

    p_t = prob * t + (1.0 - prob) * (1.0 - t)
    w = 1.0 - p_t
    if gamma == 2.0:          # common/default case: avoid pow (2 EUP transcendentals)
        focal = w * w
    elif gamma == 1.0:
        focal = w
    elif gamma == 0.0:
        focal = jnp.ones_like(w)
    else:
        focal = w ** gamma
    loss = bce * focal

    if needs_mask:
        # Zero out the padded tail (only generated when padding exists).
        i = pl.program_id(0)
        row_ids = jax.lax.broadcasted_iota(jnp.int32, loss.shape, 0)
        lane_ids = jax.lax.broadcasted_iota(jnp.int32, loss.shape, 1)
        flat_ids = (i * row_tile + row_ids) * LANES + lane_ids
        loss = jnp.where(flat_ids < total_elems, loss, 0.0)

    # In-tile reduction to a vreg-shaped partial sum using only VPU adds
    # (the (row_tile//8, 8, 128) split matches the native (8,128) tiling).
    partial_ref[...] = loss.reshape(-1, SUBLANES, LANES).sum(axis=0)


def focal_bce(logits, targets, gamma=2.0):
    """Pallas implementation of FocalBCE.forward (returns scalar mean loss)."""
    assert logits.shape == targets.shape
    total = logits.size

    rows = pl.cdiv(total, LANES)
    row_tile = min(MAX_ROW_TILE, _round_up(rows, SUBLANES))
    n_tiles = pl.cdiv(rows, row_tile)
    padded_total = n_tiles * row_tile * LANES
    needs_mask = padded_total != total

    xf = logits.reshape(-1)
    tf = targets.reshape(-1)
    if needs_mask:
        pad = padded_total - total
        xf = jnp.pad(xf, (0, pad))
        tf = jnp.pad(tf, (0, pad))
    x2d = xf.reshape(n_tiles * row_tile, LANES)
    t2d = tf.reshape(n_tiles * row_tile, LANES)

    kernel = functools.partial(
        _focal_bce_kernel,
        gamma=float(gamma),
        total_elems=total,
        needs_mask=needs_mask,
        row_tile=row_tile,
    )

    partials = pl.pallas_call(
        kernel,
        out_shape=jax.ShapeDtypeStruct((n_tiles, SUBLANES, LANES), jnp.float32),
        grid_spec=pl.GridSpec(
            grid=(n_tiles,),
            in_specs=[
                pl.BlockSpec((row_tile, LANES), lambda i: (i, 0)),
                pl.BlockSpec((row_tile, LANES), lambda i: (i, 0)),
            ],
            # First dim squeezed: kernel sees an (8, 128) partial-sum block.
            out_specs=pl.BlockSpec((None, SUBLANES, LANES), lambda i: (i, 0, 0)),
        ),
        compiler_params=pltpu.CompilerParams(
            dimension_semantics=("parallel",)
        ),
    )(x2d, t2d)

    # Final cross-lane reduction + mean scaling done once, outside the hot loop.
    return partials.sum() * (1.0 / total)


def focal_bce_ref(logits, targets, gamma=2.0):
    x = logits.astype(jnp.float32)
    t = targets.astype(jnp.float32)
    prob = jax.nn.sigmoid(x)
    bce = jnp.maximum(x, 0.0) - x * t + jnp.log1p(jnp.exp(-jnp.abs(x)))
    p_t = prob * t + (1.0 - prob) * (1.0 - t)
    return jnp.mean(bce * (1.0 - p_t) ** gamma)


if __name__ == "__main__":
    key = jax.random.PRNGKey(0)
    k1, k2 = jax.random.split(key)

    # NCHW: batch=2, channels=4, spatial=16x16
    shape = (2, 4, 16, 16)
    logits = jax.random.normal(k1, shape, dtype=jnp.float32) * 2.0
    targets = (jax.random.uniform(k2, shape) > 0.5).astype(jnp.float32)

    gamma = 2.0  # args.gamma
    loss = focal_bce(logits, targets, gamma=gamma)
    jax.block_until_ready(loss)

    ref = focal_bce_ref(logits, targets, gamma=gamma)
    assert jnp.allclose(loss, ref, atol=1e-5, rtol=1e-5), (loss, ref)

    # Also exercise a non-tile-multiple shape to cover the masked-tail path.
    shape2 = (3, 5, 13, 7)
    l2 = jax.random.normal(k1, shape2, dtype=jnp.float32) * 2.0
    t2 = (jax.random.uniform(k2, shape2) > 0.5).astype(jnp.float32)
    loss2 = focal_bce(l2, t2, gamma=gamma)
    jax.block_until_ready(loss2)
    ref2 = focal_bce_ref(l2, t2, gamma=gamma)
    assert jnp.allclose(loss2, ref2, atol=1e-5, rtol=1e-5), (loss2, ref2)

    print("KERNEL_OK")
</pallas_src>

<mosaic_0001>
module attributes {stable_mosaic.version = 11 : i64} {
  func.func @_focal_bce_kernel(%arg0: i32, %arg1: memref<16x128xf32, #tpu.memory_space<vmem>>, %arg2: memref<16x128xf32, #tpu.memory_space<vmem>>, %arg3: memref<1x8x128xf32, #tpu.memory_space<vmem>>) attributes {dimension_semantics = [#tpu.dimension_semantics<parallel>], iteration_bounds = array<i64: 1>, scalar_prefetch = 0 : i64, scratch_operands = 0 : i64, tpu.core_type = #tpu.core_type<tc>, window_params = [{transform_indices = @transform_0, window_bounds = array<i64: 16, 128>}, {transform_indices = @transform_1, window_bounds = array<i64: 16, 128>}, {transform_indices = @transform_2, window_bounds = array<i64: 1, 8, 128>}]} {
    %c0 = arith.constant 0 : index
    %c0_0 = arith.constant 0 : index
    %0 = vector.load %arg1[%c0, %c0_0] : memref<16x128xf32, #tpu.memory_space<vmem>>, vector<16x128xf32>
    %c0_1 = arith.constant 0 : index
    %c0_2 = arith.constant 0 : index
    %1 = vector.load %arg2[%c0_1, %c0_2] : memref<16x128xf32, #tpu.memory_space<vmem>>, vector<16x128xf32>
    %2 = math.absf %0 : vector<16x128xf32>
    %cst = arith.constant 0.000000e+00 : f32
    %3 = vector.broadcast %cst : f32 to vector<16x128xf32>
    %4 = arith.subf %3, %2 : vector<16x128xf32>
    %5 = math.exp %4 : vector<16x128xf32>
    %cst_3 = arith.constant 1.000000e+00 : f32
    %6 = vector.broadcast %cst_3 : f32 to vector<16x128xf32>
    %7 = arith.addf %6, %5 : vector<16x128xf32>
    %cst_4 = arith.constant 1.000000e+00 : f32
    %8 = vector.broadcast %cst_4 : f32 to vector<16x128xf32>
    %9 = arith.divf %8, %7 : vector<16x128xf32>
    %cst_5 = arith.constant 0.000000e+00 : f32
    %10 = vector.broadcast %cst_5 : f32 to vector<16x128xf32>
    %11 = arith.cmpf oge, %0, %10 : vector<16x128xf32>
    %12 = arith.mulf %5, %9 : vector<16x128xf32>
    %13 = arith.select %11, %9, %12 : vector<16x128xi1>, vector<16x128xf32>
    %cst_6 = arith.constant 0.000000e+00 : f32
    %14 = vector.broadcast %cst_6 : f32 to vector<16x128xf32>
    %15 = arith.maximumf %0, %14 : vector<16x128xf32>
    %16 = arith.mulf %0, %1 : vector<16x128xf32>
    %17 = arith.subf %15, %16 : vector<16x128xf32>
    %18 = math.log1p %5 : vector<16x128xf32>
    %19 = arith.addf %17, %18 : vector<16x128xf32>
    %20 = arith.mulf %13, %1 : vector<16x128xf32>
    %cst_7 = arith.constant 1.000000e+00 : f32
    %21 = vector.broadcast %cst_7 : f32 to vector<16x128xf32>
    %22 = arith.subf %21, %13 : vector<16x128xf32>
    %cst_8 = arith.constant 1.000000e+00 : f32
    %23 = vector.broadcast %cst_8 : f32 to vector<16x128xf32>
    %24 = arith.subf %23, %1 : vector<16x128xf32>
    %25 = arith.mulf %22, %24 : vector<16x128xf32>
    %26 = arith.addf %20, %25 : vector<16x128xf32>
    %cst_9 = arith.constant 1.000000e+00 : f32
    %27 = vector.broadcast %cst_9 : f32 to vector<16x128xf32>
    %28 = arith.subf %27, %26 : vector<16x128xf32>
    %29 = arith.mulf %28, %28 : vector<16x128xf32>
    %30 = arith.mulf %19, %29 : vector<16x128xf32>
    %31 = vector.shape_cast %30 : vector<16x128xf32> to vector<2x8x128xf32>
    %cst_10 = arith.constant dense<0.000000e+00> : vector<8x128xf32>
    %32 = vector.multi_reduction <add>, %31, %cst_10 [0] : vector<2x8x128xf32> to vector<8x128xf32>
    %c0_11 = arith.constant 0 : index
    %c0_12 = arith.constant 0 : index
    %c0_13 = arith.constant 0 : index
    %33 = vector.load %arg3[%c0_11, %c0_12, %c0_13] : memref<1x8x128xf32, #tpu.memory_space<vmem>>, vector<1x8x128xf32>
    %34 = vector.shape_cast %33 : vector<1x8x128xf32> to vector<8x128xf32>
    %35 = vector.shape_cast %32 : vector<8x128xf32> to vector<1x8x128xf32>
    tpu.vector_store %arg3[%c0_11, %c0_12, %c0_13], %35 {strides = array<i32>} : memref<1x8x128xf32, #tpu.memory_space<vmem>>, vector<1x8x128xf32>,
    return
  }
  func.func @transform_0(%arg0: i32) -> (i32, i32) {
    %c0_i32 = arith.constant 0 : i32
    %c0_i32_0 = arith.constant 0 : i32
    return %arg0, %c0_i32 : i32, i32
  }
  func.func @transform_1(%arg0: i32) -> (i32, i32) {
    %c0_i32 = arith.constant 0 : i32
    %c0_i32_0 = arith.constant 0 : i32
    return %arg0, %c0_i32 : i32, i32
  }
  func.func @transform_2(%arg0: i32) -> (i32, i32, i32) {
    %c0_i32 = arith.constant 0 : i32
    %c0_i32_0 = arith.constant 0 : i32
    %c0_i32_1 = arith.constant 0 : i32
    return %arg0, %c0_i32, %c0_i32_0 : i32, i32, i32
  }
}

</mosaic_0001>

<bundles_post_ra>
// kernel: tpu_custom_call.1
= control target key start
LH: loop header
LB: loop body
LE: loop exit
PB: predicated region body
PF: predicated region fallthrough
CT: control target
= control target key end

     0   :  { %7 = vsyncpa [#allocation3], 0  ;;  %s323_s0 = inlined_call_operand.hbm [shape: f32[16,128], index: 0, kind: input, shape index: {}]   ;;  %s324_s1 = inlined_call_operand.hbm [shape: f32[16,128], index: 1, kind: input, shape index: {}]   ;;  %s325_s2 = inlined_call_operand.hbm [shape: f32[1,8,128], index: 2, kind: output, shape index: {}]  }
   0x1   :  { %8 = vsyncpa [#allocation6], 0 }
   0x2   :  { %9 = vsyncpa [#allocation4], 0  ;;  %s14_s11 = sshll.u32 %s323_s0, 4  ;;  %s251_s12 = smov [#allocation2]   ;;  %s15_s11 = int_to_ptr.hbm [resolvable:$true] %s14_s11 }
   0x3   :  { %s16_s13 = sshll.u32 %s251_s12, 4  ;;  %s27_s16 = sshll.u32 %s324_s1, 4  ;;  %s17_s13 = int_to_ptr.vmem [resolvable:$true] %s16_s13  ;;  %s28_s16 = int_to_ptr.hbm [resolvable:$true] %s27_s16 }
   0x4   :  { %s252_s17 = smov 128   ;;  %s253_s18 = smov 8  }
   0x5   :  { %22 = dma.hbm_to_vmem [thread:$0]  %s15_s11, 256, %s17_s13, [#allocation3], %s252_s17, %s252_s17, %s253_s18  }
   0x6   :  { %s254_s19 = smov [#allocation5]  }
   0x7   :  { %s29_s20 = sshll.u32 %s254_s19, 4  ;;  %s30_s20 = int_to_ptr.vmem [resolvable:$true] %s29_s20 }
   0x8   :  { %35 = dma.hbm_to_vmem [thread:$0]  %s28_s16, 256, %s30_s20, [#allocation6], %s252_s17, %s252_s17, %s253_s18  }
   0x9   :  { %245 = dma.done.wait [#allocation3], 256  }
   0xa   :  { %246 = vsyncadd [#allocation3], 4294967040 }
   0xb   :  { %247 = dma.done.wait [#allocation6], 256  }
   0xc   :  { %248 = vsyncadd [#allocation6], 4294967040  ;;  %v277_v0 = vld [vmem:[#allocation2] sm:$0xff]  ;;  %v279_v1 = vld [vmem:[#allocation2 + $0x8] sm:$0xff]  ;;  %s255_s0 = smov [#allocation7]   ;;  %s145_s23 = sshll.u32 %s325_s2, 4  ;;  %s146_s23 = int_to_ptr.hbm [resolvable:$true] %s145_s23 }
   0xd   :  { %v48_v2 = vand.u32 2147483647, %v277_v0  ;;  %v49_v3 = vand.u32 2147483647, %v279_v1  ;;  %vm88_vm7 = vcmp.ge.f32.partialorder %v277_v0, 0.0  ;;  %vm89_vm9 = vcmp.ge.f32.partialorder %v279_v1, 0.0 }
   0xe   :  { %v46_v33 = vld [vmem:[#allocation5] sm:$0xff]  ;;  %v47_v34 = vld [vmem:[#allocation5 + $0x8] sm:$0xff]  ;;  %v94_v36 = vmax.f32 %v277_v0, 0.0  ;;  %v95_v42 = vmax.f32 %v279_v1, 0.0  ;;  %s143_s1 = sshll.u32 %s255_s0, 4  ;;  %s144_s1 = int_to_ptr.vmem [resolvable:$true] %s143_s1 }
   0xf   :  { %v50_v4 = vsub.f32 0.0, %v48_v2  ;;  %v51_v5 = vsub.f32 0.0, %v49_v3  ;;  %v96_v43 = vmul.f32 %v46_v33, %v277_v0  ;;  %v97_v47 = vmul.f32 %v47_v34, %v279_v1 }
  0x10   :  { %v124_v51 = vsub.f32 1.0, %v46_v33  ;;  %v125_v52 = vsub.f32 1.0, %v47_v34 }
  0x11   :  { %v52_v6 = vmul.f32 1.442695, %v50_v4  ;;  %v54_v7 = vmul.f32 1.442695, %v51_v5  ;;  %v98_v63 = vsub.f32 %v94_v36, %v96_v43  ;;  %v99_v3 = vsub.f32 %v95_v42, %v97_v47 }
  0x13   :  { %161 = vpow2.f32 %v52_v6 }
  0x14   :  { %163 = vpow2.f32 %v54_v7 }
  0x19   :  { %v162_v8 = vpop.eup %161 }
  0x1a   :  { %v283_v9 = vpop.eup %163  ;;  %v56_v10 = vadd.f32 1.0, %v162_v8  ;;  %v103_v23 = vmul.f32 -0.5, %v162_v8  ;;  %v106_v32 = vand.u32 2147483647, %v162_v8 }
  0x1b   :  { %v57_v11 = vadd.f32 1.0, %v283_v9  ;;  %v112_v24 = vmul.f32 -0.5, %v283_v9  ;;  %v115_v48 = vand.u32 2147483647, %v283_v9 }
  0x1c   :  { %165 = vrcp.f32 %v56_v10  ;;  %vm63_vm0 = vweird.f32 %v56_v10  ;;  %v67_v15 = vand.u32 2147483647, %v56_v10  ;;  %v69_v16 = vand.u32 2147483648, %v56_v10 }
  0x1d   :  { %167 = vrcp.f32 %v57_v11  ;;  %vm78_vm2 = vweird.f32 %v57_v11  ;;  %v84_v19 = vand.u32 2147483648, %v57_v11  ;;  %v82_v21 = vand.u32 2147483647, %v57_v11 }
  0x1e   :  { %169 = vlog2.f32 %v56_v10  ;;  %v70_v26 = vor.u32 1.1754944e-38, %v69_v16  ;;  %vm68_vm5 = vcmp.eq.f32.partialorder %v67_v15, 8.507059e+37  ;;  %v104_v37 = vadd.f32 1.0, %v103_v23 }
  0x1f   :  { %171 = vlog2.f32 %v57_v11  ;;  %v85_v30 = vor.u32 1.1754944e-38, %v84_v19  ;;  %vm83_vm8 = vcmp.eq.f32.partialorder %v82_v21, 8.507059e+37  ;;  %v113_v38 = vadd.f32 1.0, %v112_v24 }
  0x20   :  { %vm309_vm10 = vcmp.lt.f32.partialorder %v106_v32, 0.0004427343  ;;  %v105_v55 = vmul.f32 %v162_v8, %v104_v37  ;;  %vm116_vm11 = vcmp.lt.f32.partialorder %v115_v48, 0.0004427343 }
  0x21   :  { %v114_v56 = vmul.f32 %v283_v9, %v113_v38 }
  0x22   :  { %v166_v12 = vpop.eup %165 }
  0x23   :  { %v168_v13 = vpop.eup %167  ;;  %v59_v14 = vmul.f32 %v166_v12, %v56_v10  ;;  %vm64_vm1 = vweird.f32 %v166_v12 }
  0x24   :  { %v74_v17 = vmul.f32 %v168_v13, %v57_v11  ;;  %vm79_vm3 = vweird.f32 %v168_v13  ;;  %vm288_vm4 = vmor %vm63_vm0, %vm64_vm1  ;;  %v170_v39 = vpop.eup %169 }
  0x25   :  { %v60_v18 = vsub.f32 1.0, %v59_v14  ;;  %vm293_vm6 = vmor %vm78_vm2, %vm79_vm3  ;;  %v172_v44 = vpop.eup %171  ;;  %v102_v54 = vmul.f32 0.6931472, %v170_v39 }
  0x26   :  { %v75_v20 = vsub.f32 1.0, %v74_v17  ;;  %v111_v58 = vmul.f32 0.6931472, %v172_v44 }
  0x27   :  { %v61_v22 = vmul.f32 %v166_v12, %v60_v18  ;;  %v108_v0 = vsel %vm309_vm10, %v105_v55, %v102_v54 }
  0x28   :  { %v76_v27 = vmul.f32 %v168_v13, %v75_v20  ;;  %v117_v5 = vsel %vm116_vm11, %v114_v56, %v111_v58 }
  0x29   :  { %v62_v28 = vadd.f32 %v166_v12, %v61_v22  ;;  %v119_v1 = vadd.f32 %v117_v5, %v99_v3 }
  0x2a   :  { %v77_v31 = vadd.f32 %v168_v13, %v76_v27 }
  0x2b   :  { %v66_v35 = vsel %vm288_vm4, %v166_v12, %v62_v28 }
  0x2c   :  { %v71_v40 = vsel %vm68_vm5, %v70_v26, %v66_v35  ;;  %v81_v41 = vsel %vm293_vm6, %v168_v13, %v77_v31 }
  0x2d   :  { %v86_v45 = vsel %vm83_vm8, %v85_v30, %v81_v41  ;;  %v90_v46 = vmul.f32 %v162_v8, %v71_v40  ;;  %v118_v8 = vadd.f32 %v108_v0, %v98_v63 }
  0x2e   :  { %v91_v49 = vmul.f32 %v283_v9, %v86_v45 }
  0x2f   :  { %v92_v53 = vsel %vm88_vm7, %v71_v40, %v90_v46 }
  0x30   :  { %v93_v57 = vsel %vm89_vm9, %v86_v45, %v91_v49  ;;  %v120_v59 = vmul.f32 %v92_v53, %v46_v33  ;;  %v122_v60 = vsub.f32 1.0, %v92_v53 }
  0x31   :  { %v121_v61 = vmul.f32 %v93_v57, %v47_v34  ;;  %v123_v62 = vsub.f32 1.0, %v93_v57 }
  0x32   :  { %v126_v2 = vmul.f32 %v124_v51, %v122_v60 }
  0x33   :  { %v127_v4 = vmul.f32 %v125_v52, %v123_v62 }
  0x34   :  { %v128_v6 = vadd.f32 %v126_v2, %v120_v59 }
  0x35   :  { %v129_v7 = vadd.f32 %v127_v4, %v121_v61 }
  0x36   :  { %v130_v9 = vsub.f32 1.0, %v128_v6 }
  0x37   :  { %v131_v10 = vsub.f32 1.0, %v129_v7 }
  0x38   :  { %v132_v11 = vmul.f32 %v130_v9, %v130_v9 }
  0x39   :  { %v133_v12 = vmul.f32 %v131_v10, %v131_v10 }
  0x3a   :  { %v134_v13 = vmul.f32 %v132_v11, %v118_v8 }
  0x3b   :  { %v135_v14 = vmul.f32 %v133_v12, %v119_v1 }
  0x3d   :  { %v136_v15 = vadd.f32 %v135_v14, %v134_v13 }
  0x3f   :  { %137 = vst [vmem:[#allocation7] sm:$0xff] %v136_v15 }
  0x40   :  { %148 = dma.vmem_to_hbm [thread:$0]  %s144_s1, 128, %s146_s23, [#allocation4]  }
  0x41   :  { %249 = dma.done.wait [#allocation4], 128  }
  0x42   :  { %250 = vsyncadd [#allocation4], 4294967168 }
  0x43   :  { %153 = vsyncpa [#allocation3], 1 }
  0x44   :  { %154 = vsyncpa [#allocation6], 1 }
  0x45   :  { %155 = vsyncpa [#allocation4], 1 }

</bundles_post_ra>
